<compile_context>
chip_gen: v6e
topology: v6e:2x2x1
jax: 0.10.0
libtpu: 0.0.40
codegen_flags: <defaults>
</compile_context>

<pallas_src>
import functools
from math import sqrt

import jax
import jax.numpy as jnp
from jax.experimental import pallas as pl
from jax.experimental.pallas import tpu as pltpu


_MASK_NEG = -1e30                 # finite: exactly 0 prob after softmax, no NaN
_VMEM_LIMIT = 32 * 1024 * 1024    # explicit scoped-VMEM cap; safe on v5e/v6e/v7x


def _pick_row_tile(n, target):
    """Largest multiple-of-8 divisor of n that is <= target (else n itself)."""
    if n <= target:
        return n
    t = (target // 8) * 8
    while t >= 8:
        if n % t == 0:
            return t
        t -= 8
    return n


# ----------------------------------------------------------------------------
# Kernel 1: fused Q/K/V projection, row-tiled ("parallel" grid, weights resident)
# ----------------------------------------------------------------------------
def _qkv_proj_kernel(q_ref, k_ref, v_ref,
                     wq_ref, bq_ref, wk_ref, bk_ref, wv_ref, bv_ref,
                     qo_ref, ko_ref, vo_ref, *, q_scale):
    # f32 -> bf16 cast happens in VMEM (saves a separate XLA cast pass over HBM).
    q_acc = jnp.dot(q_ref[...].astype(jnp.bfloat16), wq_ref[...],
                    preferred_element_type=jnp.float32) + bq_ref[...]
    if q_scale != 1.0:
        q_acc = q_acc * q_scale        # softmax 1/sqrt(dk) folded into Q (f32)
    qo_ref[...] = q_acc.astype(qo_ref.dtype)
    ko_ref[...] = (jnp.dot(k_ref[...].astype(jnp.bfloat16), wk_ref[...],
                           preferred_element_type=jnp.float32)
                   + bk_ref[...]).astype(ko_ref.dtype)
    vo_ref[...] = (jnp.dot(v_ref[...].astype(jnp.bfloat16), wv_ref[...],
                           preferred_element_type=jnp.float32)
                   + bv_ref[...]).astype(vo_ref.dtype)


def qkv_projection(q_in, k_in, v_in, params, *, q_scale, block_rows=512):
    """q_in/k_in/v_in: (N, D) f32, equal row counts.  Row-tiled fused launch."""
    n, d_model = q_in.shape
    hdk = params["wq_t"].shape[1]
    hdv = params["wv_t"].shape[1]
    bm = _pick_row_tile(n, block_rows)
    kernel = functools.partial(_qkv_proj_kernel, q_scale=q_scale)
    return pl.pallas_call(
        kernel,
        out_shape=(
            jax.ShapeDtypeStruct((n, hdk), jnp.bfloat16),
            jax.ShapeDtypeStruct((n, hdk), jnp.bfloat16),
            jax.ShapeDtypeStruct((n, hdv), jnp.bfloat16),
        ),
        grid=(pl.cdiv(n, bm),),
        in_specs=[
            pl.BlockSpec((bm, d_model), lambda i: (i, 0)),
            pl.BlockSpec((bm, d_model), lambda i: (i, 0)),
            pl.BlockSpec((bm, d_model), lambda i: (i, 0)),
            pl.BlockSpec((d_model, hdk), lambda i: (0, 0)),   # resident weights
            pl.BlockSpec((1, hdk), lambda i: (0, 0)),
            pl.BlockSpec((d_model, hdk), lambda i: (0, 0)),
            pl.BlockSpec((1, hdk), lambda i: (0, 0)),
            pl.BlockSpec((d_model, hdv), lambda i: (0, 0)),
            pl.BlockSpec((1, hdv), lambda i: (0, 0)),
        ],
        out_specs=(
            pl.BlockSpec((bm, hdk), lambda i: (i, 0)),
            pl.BlockSpec((bm, hdk), lambda i: (i, 0)),
            pl.BlockSpec((bm, hdv), lambda i: (i, 0)),
        ),
        compiler_params=pltpu.CompilerParams(
            dimension_semantics=("parallel",),
            vmem_limit_bytes=_VMEM_LIMIT),
    )(q_in, k_in, v_in,
      params["wq_t"], params["bq"],
      params["wk_t"], params["bk"],
      params["wv_t"], params["bv"])


# ----------------------------------------------------------------------------
# Kernel 2: generic row-tiled linear (Q fallback when L != S, output projection)
# ----------------------------------------------------------------------------
def _linear_kernel(x_ref, w_ref, b_ref, o_ref, *, scale):
    acc = jnp.dot(x_ref[...].astype(jnp.bfloat16), w_ref[...],
                  preferred_element_type=jnp.float32) + b_ref[...]
    if scale != 1.0:
        acc = acc * scale
    o_ref[...] = acc.astype(o_ref.dtype)


def linear(x, w_t, b, *, out_dtype=jnp.float32, scale=1.0, block_rows=512):
    """y = (x @ w_t + b) * scale.  x: (N, Din) f32 or bf16 (cast in-kernel),
    w_t: (Din, Dout) bf16 pre-transposed, b: (1, Dout) f32."""
    n, din = x.shape
    dout = w_t.shape[1]
    bm = _pick_row_tile(n, block_rows)
    kernel = functools.partial(_linear_kernel, scale=scale)
    return pl.pallas_call(
        kernel,
        out_shape=jax.ShapeDtypeStruct((n, dout), out_dtype),
        grid=(pl.cdiv(n, bm),),
        in_specs=[
            pl.BlockSpec((bm, din), lambda i: (i, 0)),
            pl.BlockSpec((din, dout), lambda i: (0, 0)),
            pl.BlockSpec((1, dout), lambda i: (0, 0)),
        ],
        out_specs=pl.BlockSpec((bm, dout), lambda i: (i, 0)),
        compiler_params=pltpu.CompilerParams(
            dimension_semantics=("parallel",),
            vmem_limit_bytes=_VMEM_LIMIT),
    )(x, w_t, b)


# ----------------------------------------------------------------------------
# Kernel 3: multi-head attention, grid = (B, L-tiles), both axes "parallel"
# ----------------------------------------------------------------------------
def _mha_kernel(q_ref, k_ref, v_ref, m_ref, *out_refs,
                H, dk, dv, mix, return_attn):
    ctx_ref = out_refs[0]
    q = q_ref[0]       # (tl, H*dk) bf16, already scaled by 1/sqrt(dk)
    k = k_ref[0]       # (S,  H*dk) bf16
    v = v_ref[0]       # (S,  H*dv) bf16
    madd = m_ref[0]    # (1, S) f32 additive mask (0 / -1e30), H-invariant

    dn = (((1,), (1,)), ((), ()))    # contract last dims, no batch dims
    ctx_parts = []
    for h in range(H):                           # static head count -> unrolled
        q_h = q[:, h * dk:(h + 1) * dk]          # (tl, dk)
        k_h = k[:, h * dk:(h + 1) * dk]          # (S,  dk)
        v_h = v[:, h * dv:(h + 1) * dv]          # (S,  dv)
        s = jax.lax.dot_general(q_h, k_h, dn,
                                preferred_element_type=jnp.float32)   # (tl, S)
        s = s + madd                             # additive mask, broadcast over rows
        m = jnp.max(s, axis=-1, keepdims=True)
        e = jnp.exp(s - m)
        denom = jnp.sum(e, axis=-1, keepdims=True)
        if return_attn:
            p = e / denom                        # exact probabilities when returned
            out_refs[1][0, h] = p.astype(out_refs[1].dtype)   # per-head bf16 store
        else:
            p = e * pl.reciprocal(denom, approx=True)         # EUP slot, ~free
        ctx_h = jnp.dot(p.astype(jnp.bfloat16), v_h,
                        preferred_element_type=jnp.float32)   # (tl, dv)
        if mix:
            ctx_ref[0, h] = ctx_h.astype(ctx_ref.dtype)       # (B,H,L,dv) layout
        else:
            ctx_parts.append(ctx_h.astype(ctx_ref.dtype))
    if not mix:
        ctx_ref[0] = jnp.concatenate(ctx_parts, axis=-1)      # lane-dense (tl, H*dv)


def multihead_attention(q3, k3, v3, madd, *, n_heads, mix, return_attn,
                        l_block=128):
    """q3: (B, L, H*dk) bf16, k3: (B, S, H*dk), v3: (B, S, H*dv),
    madd: (B, 1, S) f32 additive mask.  Returns ctx bf16 (layout depends on mix)
    and optionally attn bf16 (B, H, L, S)."""
    B, L, hdk = q3.shape
    S = k3.shape[1]
    hdv = v3.shape[2]
    H = n_heads
    dk = hdk // H
    dv = hdv // H
    tl = _pick_row_tile(L, l_block)

    if mix:
        ctx_shape = jax.ShapeDtypeStruct((B, H, L, dv), jnp.bfloat16)
        ctx_spec = pl.BlockSpec((1, H, tl, dv), lambda b, lt: (b, 0, lt, 0))
    else:
        ctx_shape = jax.ShapeDtypeStruct((B, L, hdv), jnp.bfloat16)
        ctx_spec = pl.BlockSpec((1, tl, hdv), lambda b, lt: (b, lt, 0))

    out_shape = [ctx_shape]
    out_specs = [ctx_spec]
    if return_attn:
        out_shape.append(jax.ShapeDtypeStruct((B, H, L, S), jnp.bfloat16))
        out_specs.append(pl.BlockSpec((1, H, tl, S), lambda b, lt: (b, 0, lt, 0)))

    kernel = functools.partial(_mha_kernel, H=H, dk=dk, dv=dv,
                               mix=mix, return_attn=return_attn)
    # TODO(synk): flash-style online-softmax S-tiling for very long sequences
    # (v7x 64 MiB VMEM); the (tl, S) score block fits easily at tracker scales.
    outs = pl.pallas_call(
        kernel,
        out_shape=tuple(out_shape),
        grid=(B, pl.cdiv(L, tl)),
        in_specs=[
            pl.BlockSpec((1, tl, hdk), lambda b, lt: (b, lt, 0)),
            pl.BlockSpec((1, S, hdk), lambda b, lt: (b, 0, 0)),
            pl.BlockSpec((1, S, hdv), lambda b, lt: (b, 0, 0)),
            pl.BlockSpec((1, 1, S), lambda b, lt: (b, 0, 0)),
        ],
        out_specs=tuple(out_specs),
        compiler_params=pltpu.CompilerParams(
            dimension_semantics=("parallel", "parallel"),
            vmem_limit_bytes=_VMEM_LIMIT),
    )(q3, k3, v3, madd)
    if return_attn:
        return outs[0], outs[1]
    return outs[0], None


# ----------------------------------------------------------------------------
# AttentionLayer forward (glue is free reshapes; hot path is the kernels)
# ----------------------------------------------------------------------------
def attention_layer_forward(params, queries, keys, values, attn_mask, n_heads,
                            mix=False, return_attn=True):
    L, B, d_model = queries.shape
    S = keys.shape[0]
    H = n_heads
    hdk = params["wq_t"].shape[1]
    hdv = params["wv_t"].shape[1]
    dk = hdk // H
    scale = 1.0 / sqrt(dk)

    q_in = queries.reshape(L * B, d_model)
    k_in = keys.reshape(S * B, d_model)
    v_in = values.reshape(S * B, d_model)

    if q_in.shape[0] == k_in.shape[0]:
        # common (self-attention / L == S) case: one fused, row-tiled launch
        q2, k2, v2 = qkv_projection(q_in, k_in, v_in, params, q_scale=scale)
    else:
        q2 = linear(q_in, params["wq_t"], params["bq"],
                    out_dtype=jnp.bfloat16, scale=scale)
        k2 = linear(k_in, params["wk_t"], params["bk"], out_dtype=jnp.bfloat16)
        v2 = linear(v_in, params["wv_t"], params["bv"], out_dtype=jnp.bfloat16)

    # torch .view(B, L, H, -1) on the contiguous (L, B, H*dk) projection output:
    # a pure memory reinterpretation -> free reshapes (no HBM transposes); the
    # head split happens inside the attention kernel via lane slices.
    q3 = q2.reshape(B, L, hdk)
    k3 = k2.reshape(B, S, hdk)
    v3 = v2.reshape(B, S, hdv)

    # torch: attn_mask.expand(H, S, B, 1).permute(2, 0, 3, 1) -> (B, H, 1, S),
    # masked_fill(-inf).  The expanded mask is H-invariant, so keep a compact
    # (B, 1, S) additive mask (0 / -1e30: no NaN on fully-masked rows).
    mask_sb = jnp.broadcast_to(attn_mask, (H, S, B, 1))[0, :, :, 0]       # (S, B)
    madd = jnp.where(mask_sb.T[:, None, :], jnp.float32(_MASK_NEG),
                     jnp.float32(0.0))                                     # (B, 1, S)

    ctx, attn = multihead_attention(q3, k3, v3, madd, n_heads=H, mix=mix,
                                    return_attn=return_attn)

    # mix=False: ctx is (B, L, H*dv).  mix=True: ctx is (B, H, L, dv), emitted
    # directly in the transposed layout by the kernel (no XLA transpose copy).
    # Either way torch's .view(L, B, -1) is a free reinterpretation.
    flat = ctx.reshape(L * B, hdv)
    y = linear(flat, params["wo_t"], params["bo"], out_dtype=jnp.float32)
    return y.reshape(L, B, d_model), attn


# ----------------------------------------------------------------------------
# deterministic parameter init (torch nn.Linear default: U(-1/sqrt(fan_in), ..)),
# weights stored pre-transposed (Din, Dout) and pre-cast bf16; biases f32 (1, Dout)
# ----------------------------------------------------------------------------
def init_params(key, d_model, n_heads, d_keys=None, d_values=None):
    d_keys = d_keys or d_model // n_heads
    d_values = d_values or d_model // n_heads
    ks = jax.random.split(key, 8)

    def lin(wk, bk, dout, din):
        bound = 1.0 / sqrt(din)
        w = jax.random.uniform(wk, (dout, din), jnp.float32, -bound, bound)
        b = jax.random.uniform(bk, (dout,), jnp.float32, -bound, bound)
        return w.T.astype(jnp.bfloat16), b.reshape(1, dout).astype(jnp.float32)

    wq_t, bq = lin(ks[0], ks[1], d_keys * n_heads, d_model)
    wk_t, bk = lin(ks[2], ks[3], d_keys * n_heads, d_model)
    wv_t, bv = lin(ks[4], ks[5], d_values * n_heads, d_model)
    wo_t, bo = lin(ks[6], ks[7], d_model, d_values * n_heads)
    return dict(wq_t=wq_t, bq=bq, wk_t=wk_t, bk=bk, wv_t=wv_t, bv=bv,
                wo_t=wo_t, bo=bo)


# ----------------------------------------------------------------------------
# pure-JAX reference (same bf16 weights, f32 math) for a loose correctness check
# ----------------------------------------------------------------------------
def reference_forward(params, queries, keys, values, attn_mask, n_heads, mix=False):
    L, B, d_model = queries.shape
    S = keys.shape[0]
    H = n_heads
    wq = params["wq_t"].astype(jnp.float32); bq = params["bq"][0]
    wk = params["wk_t"].astype(jnp.float32); bk = params["bk"][0]
    wv = params["wv_t"].astype(jnp.float32); bv = params["bv"][0]
    wo = params["wo_t"].astype(jnp.float32); bo = params["bo"][0]
    hdk = wq.shape[1]; hdv = wv.shape[1]
    dk = hdk // H; dv = hdv // H

    q = (queries.reshape(L * B, d_model) @ wq + bq).reshape(B, L, H, dk)
    k = (keys.reshape(S * B, d_model) @ wk + bk).reshape(B, S, H, dk)
    v = (values.reshape(S * B, d_model) @ wv + bv).reshape(B, S, H, dv)

    scores = jnp.einsum("blhe,bshe->bhls", q, k) / sqrt(dk)
    mask = jnp.broadcast_to(attn_mask, (H, S, B, 1))[..., 0]      # (H, S, B)
    mask = mask.transpose(2, 0, 1)[:, :, None, :]                 # (B, H, 1, S)
    scores = jnp.where(mask, _MASK_NEG, scores)
    a = jax.nn.softmax(scores, axis=-1)                           # (B, H, L, S)
    out = jnp.einsum("bhls,bshd->blhd", a, v)                     # (B, L, H, dv)
    if mix:
        out = out.transpose(0, 2, 1, 3)
    y = out.reshape(L * B, hdv) @ wo + bo
    return y.reshape(L, B, d_model), a


# ----------------------------------------------------------------------------
if __name__ == "__main__":
    d_model, n_heads = 32, 4
    L, S, B = 8, 8, 2

    key = jax.random.PRNGKey(0)
    kq, kk, kv, kp = jax.random.split(key, 4)
    queries = jax.random.normal(kq, (L, B, d_model), jnp.float32)
    keys_in = jax.random.normal(kk, (S, B, d_model), jnp.float32)
    values = jax.random.normal(kv, (S, B, d_model), jnp.float32)

    # bool key-padding mask broadcastable to (H, S, B, 1); True == masked out.
    # Mask the last 2 keys of batch element 1.
    attn_mask = (jnp.arange(S)[:, None, None] >= S - 2) & \
                (jnp.arange(B)[None, :, None] == 1)               # (S, B, 1)

    params = init_params(kp, d_model, n_heads)

    # --- mix=False, attention matrix returned --------------------------------
    fwd = jax.jit(functools.partial(attention_layer_forward, n_heads=n_heads,
                                    mix=False, return_attn=True))
    out, attn = fwd(params, queries, keys_in, values, attn_mask)
    out = jax.block_until_ready(out)
    attn = jax.block_until_ready(attn)
    assert out.shape == (L, B, d_model) and out.dtype == jnp.float32
    assert attn.shape == (B, n_heads, L, S)
    assert bool(jnp.all(jnp.isfinite(out)))
    assert bool(jnp.all(jnp.isfinite(attn.astype(jnp.float32))))

    out_ref, attn_ref = reference_forward(params, queries, keys_in, values,
                                          attn_mask, n_heads, mix=False)
    assert float(jnp.max(jnp.abs(out - out_ref))) < 1e-1
    assert float(jnp.max(jnp.abs(attn.astype(jnp.float32) - attn_ref))) < 5e-2

    # --- mix=True, no attn (exercises the (B,H,L,dv) ctx layout + approx path) -
    fwd_mix = jax.jit(functools.partial(attention_layer_forward, n_heads=n_heads,
                                        mix=True, return_attn=False))
    out_mix, attn_none = fwd_mix(params, queries, keys_in, values, attn_mask)
    out_mix = jax.block_until_ready(out_mix)
    assert attn_none is None
    out_mix_ref, _ = reference_forward(params, queries, keys_in, values,
                                       attn_mask, n_heads, mix=True)
    assert float(jnp.max(jnp.abs(out_mix - out_mix_ref))) < 1e-1

    print("KERNEL_OK")
</pallas_src>

<mosaic_0001>
module attributes {stable_mosaic.version = 11 : i64} {
  func.func @_linear_kernel(%arg0: i32, %arg1: memref<16x32xbf16, #tpu.memory_space<vmem>>, %arg2: memref<32x32xbf16, #tpu.memory_space<vmem>>, %arg3: memref<1x32xf32, #tpu.memory_space<vmem>>, %arg4: memref<16x32xf32, #tpu.memory_space<vmem>>) attributes {dimension_semantics = [#tpu.dimension_semantics<parallel>], iteration_bounds = array<i64: 1>, scalar_prefetch = 0 : i64, scratch_operands = 0 : i64, tpu.core_type = #tpu.core_type<tc>, window_params = [{transform_indices = @transform_0, window_bounds = array<i64: 16, 32>}, {pipeline_mode = #tpu.pipeline_mode<synchronous>, transform_indices = @transform_1, window_bounds = array<i64: 32, 32>}, {pipeline_mode = #tpu.pipeline_mode<synchronous>, transform_indices = @transform_2, window_bounds = array<i64: 1, 32>}, {transform_indices = @transform_3, window_bounds = array<i64: 16, 32>}]} {
    %c0 = arith.constant 0 : index
    %c0_0 = arith.constant 0 : index
    %0 = vector.load %arg1[%c0, %c0_0] : memref<16x32xbf16, #tpu.memory_space<vmem>>, vector<16x32xbf16>
    %c0_1 = arith.constant 0 : index
    %c0_2 = arith.constant 0 : index
    %1 = vector.load %arg2[%c0_1, %c0_2] : memref<32x32xbf16, #tpu.memory_space<vmem>>, vector<32x32xbf16>
    %cst = arith.constant dense<0.000000e+00> : vector<16x32xf32>
    %2 = tpu.matmul %0, %1, %cst {dimension_numbers = #tpu.dot_dimension_numbers<[1], [0], [0], [1], [0, 0, 1, 1], [], []>} : vector<16x32xbf16>, vector<32x32xbf16>, vector<16x32xf32> -> vector<16x32xf32>
    %c0_3 = arith.constant 0 : index
    %c0_4 = arith.constant 0 : index
    %3 = vector.load %arg3[%c0_3, %c0_4] : memref<1x32xf32, #tpu.memory_space<vmem>>, vector<1x32xf32>
    %4 = vector.broadcast %3 : vector<1x32xf32> to vector<16x32xf32>
    %5 = arith.addf %2, %4 : vector<16x32xf32>
    %c0_5 = arith.constant 0 : index
    %c0_6 = arith.constant 0 : index
    %6 = vector.load %arg4[%c0_5, %c0_6] : memref<16x32xf32, #tpu.memory_space<vmem>>, vector<16x32xf32>
    tpu.vector_store %arg4[%c0_5, %c0_6], %5 {strides = array<i32>} : memref<16x32xf32, #tpu.memory_space<vmem>>, vector<16x32xf32>,
    return
  }
  func.func @transform_0(%arg0: i32) -> (i32, i32) {
    %c0_i32 = arith.constant 0 : i32
    %c0_i32_0 = arith.constant 0 : i32
    return %arg0, %c0_i32 : i32, i32
  }
  func.func @transform_1(%arg0: i32) -> (i32, i32) {
    %c0_i32 = arith.constant 0 : i32
    %c0_i32_0 = arith.constant 0 : i32
    %c0_i32_1 = arith.constant 0 : i32
    return %c0_i32, %c0_i32_0 : i32, i32
  }
  func.func @transform_2(%arg0: i32) -> (i32, i32) {
    %c0_i32 = arith.constant 0 : i32
    %c0_i32_0 = arith.constant 0 : i32
    %c0_i32_1 = arith.constant 0 : i32
    return %c0_i32, %c0_i32_0 : i32, i32
  }
  func.func @transform_3(%arg0: i32) -> (i32, i32) {
    %c0_i32 = arith.constant 0 : i32
    %c0_i32_0 = arith.constant 0 : i32
    return %arg0, %c0_i32 : i32, i32
  }
}

module attributes {stable_mosaic.version = 11 : i64} {
  func.func @_qkv_proj_kernel(%arg0: i32, %arg1: memref<16x32xf32, #tpu.memory_space<vmem>>, %arg2: memref<16x32xf32, #tpu.memory_space<vmem>>, %arg3: memref<16x32xf32, #tpu.memory_space<vmem>>, %arg4: memref<32x32xbf16, #tpu.memory_space<vmem>>, %arg5: memref<1x32xf32, #tpu.memory_space<vmem>>, %arg6: memref<32x32xbf16, #tpu.memory_space<vmem>>, %arg7: memref<1x32xf32, #tpu.memory_space<vmem>>, %arg8: memref<32x32xbf16, #tpu.memory_space<vmem>>, %arg9: memref<1x32xf32, #tpu.memory_space<vmem>>, %arg10: memref<16x32xbf16, #tpu.memory_space<vmem>>, %arg11: memref<16x32xbf16, #tpu.memory_space<vmem>>, %arg12: memref<16x32xbf16, #tpu.memory_space<vmem>>) attributes {dimension_semantics = [#tpu.dimension_semantics<parallel>], iteration_bounds = array<i64: 1>, scalar_prefetch = 0 : i64, scratch_operands = 0 : i64, tpu.core_type = #tpu.core_type<tc>, window_params = [{transform_indices = @transform_0, window_bounds = array<i64: 16, 32>}, {transform_indices = @transform_1, window_bounds = array<i64: 16, 32>}, {transform_indices = @transform_2, window_bounds = array<i64: 16, 32>}, {pipeline_mode = #tpu.pipeline_mode<synchronous>, transform_indices = @transform_3, window_bounds = array<i64: 32, 32>}, {pipeline_mode = #tpu.pipeline_mode<synchronous>, transform_indices = @transform_4, window_bounds = array<i64: 1, 32>}, {pipeline_mode = #tpu.pipeline_mode<synchronous>, transform_indices = @transform_5, window_bounds = array<i64: 32, 32>}, {pipeline_mode = #tpu.pipeline_mode<synchronous>, transform_indices = @transform_6, window_bounds = array<i64: 1, 32>}, {pipeline_mode = #tpu.pipeline_mode<synchronous>, transform_indices = @transform_7, window_bounds = array<i64: 32, 32>}, {pipeline_mode = #tpu.pipeline_mode<synchronous>, transform_indices = @transform_8, window_bounds = array<i64: 1, 32>}, {transform_indices = @transform_9, window_bounds = array<i64: 16, 32>}, {transform_indices = @transform_10, window_bounds = array<i64: 16, 32>}, {transform_indices = @transform_11, window_bounds = array<i64: 16, 32>}]} {
    %c0 = arith.constant 0 : index
    %c0_0 = arith.constant 0 : index
    %0 = vector.load %arg1[%c0, %c0_0] : memref<16x32xf32, #tpu.memory_space<vmem>>, vector<16x32xf32>
    %1 = arith.truncf %0 : vector<16x32xf32> to vector<16x32xbf16>
    %c0_1 = arith.constant 0 : index
    %c0_2 = arith.constant 0 : index
    %2 = vector.load %arg4[%c0_1, %c0_2] : memref<32x32xbf16, #tpu.memory_space<vmem>>, vector<32x32xbf16>
    %cst = arith.constant dense<0.000000e+00> : vector<16x32xf32>
    %3 = tpu.matmul %1, %2, %cst {dimension_numbers = #tpu.dot_dimension_numbers<[1], [0], [0], [1], [0, 0, 1, 1], [], []>} : vector<16x32xbf16>, vector<32x32xbf16>, vector<16x32xf32> -> vector<16x32xf32>
    %c0_3 = arith.constant 0 : index
    %c0_4 = arith.constant 0 : index
    %4 = vector.load %arg5[%c0_3, %c0_4] : memref<1x32xf32, #tpu.memory_space<vmem>>, vector<1x32xf32>
    %5 = vector.broadcast %4 : vector<1x32xf32> to vector<16x32xf32>
    %6 = arith.addf %3, %5 : vector<16x32xf32>
    %cst_5 = arith.constant 0.353553385 : f32
    %7 = vector.broadcast %cst_5 : f32 to vector<16x32xf32>
    %8 = arith.mulf %6, %7 : vector<16x32xf32>
    %9 = arith.truncf %8 : vector<16x32xf32> to vector<16x32xbf16>
    %c0_6 = arith.constant 0 : index
    %c0_7 = arith.constant 0 : index
    %10 = vector.load %arg10[%c0_6, %c0_7] : memref<16x32xbf16, #tpu.memory_space<vmem>>, vector<16x32xbf16>
    tpu.vector_store %arg10[%c0_6, %c0_7], %9 {strides = array<i32>} : memref<16x32xbf16, #tpu.memory_space<vmem>>, vector<16x32xbf16>,
    %c0_8 = arith.constant 0 : index
    %c0_9 = arith.constant 0 : index
    %11 = vector.load %arg2[%c0_8, %c0_9] : memref<16x32xf32, #tpu.memory_space<vmem>>, vector<16x32xf32>
    %12 = arith.truncf %11 : vector<16x32xf32> to vector<16x32xbf16>
    %c0_10 = arith.constant 0 : index
    %c0_11 = arith.constant 0 : index
    %13 = vector.load %arg6[%c0_10, %c0_11] : memref<32x32xbf16, #tpu.memory_space<vmem>>, vector<32x32xbf16>
    %cst_12 = arith.constant dense<0.000000e+00> : vector<16x32xf32>
    %14 = tpu.matmul %12, %13, %cst_12 {dimension_numbers = #tpu.dot_dimension_numbers<[1], [0], [0], [1], [0, 0, 1, 1], [], []>} : vector<16x32xbf16>, vector<32x32xbf16>, vector<16x32xf32> -> vector<16x32xf32>
    %c0_13 = arith.constant 0 : index
    %c0_14 = arith.constant 0 : index
    %15 = vector.load %arg7[%c0_13, %c0_14] : memref<1x32xf32, #tpu.memory_space<vmem>>, vector<1x32xf32>
    %16 = vector.broadcast %15 : vector<1x32xf32> to vector<16x32xf32>
    %17 = arith.addf %14, %16 : vector<16x32xf32>
    %18 = arith.truncf %17 : vector<16x32xf32> to vector<16x32xbf16>
    %c0_15 = arith.constant 0 : index
    %c0_16 = arith.constant 0 : index
    %19 = vector.load %arg11[%c0_15, %c0_16] : memref<16x32xbf16, #tpu.memory_space<vmem>>, vector<16x32xbf16>
    tpu.vector_store %arg11[%c0_15, %c0_16], %18 {strides = array<i32>} : memref<16x32xbf16, #tpu.memory_space<vmem>>, vector<16x32xbf16>,
    %c0_17 = arith.constant 0 : index
    %c0_18 = arith.constant 0 : index
    %20 = vector.load %arg3[%c0_17, %c0_18] : memref<16x32xf32, #tpu.memory_space<vmem>>, vector<16x32xf32>
    %21 = arith.truncf %20 : vector<16x32xf32> to vector<16x32xbf16>
    %c0_19 = arith.constant 0 : index
    %c0_20 = arith.constant 0 : index
    %22 = vector.load %arg8[%c0_19, %c0_20] : memref<32x32xbf16, #tpu.memory_space<vmem>>, vector<32x32xbf16>
    %cst_21 = arith.constant dense<0.000000e+00> : vector<16x32xf32>
    %23 = tpu.matmul %21, %22, %cst_21 {dimension_numbers = #tpu.dot_dimension_numbers<[1], [0], [0], [1], [0, 0, 1, 1], [], []>} : vector<16x32xbf16>, vector<32x32xbf16>, vector<16x32xf32> -> vector<16x32xf32>
    %c0_22 = arith.constant 0 : index
    %c0_23 = arith.constant 0 : index
    %24 = vector.load %arg9[%c0_22, %c0_23] : memref<1x32xf32, #tpu.memory_space<vmem>>, vector<1x32xf32>
    %25 = vector.broadcast %24 : vector<1x32xf32> to vector<16x32xf32>
    %26 = arith.addf %23, %25 : vector<16x32xf32>
    %27 = arith.truncf %26 : vector<16x32xf32> to vector<16x32xbf16>
    %c0_24 = arith.constant 0 : index
    %c0_25 = arith.constant 0 : index
    %28 = vector.load %arg12[%c0_24, %c0_25] : memref<16x32xbf16, #tpu.memory_space<vmem>>, vector<16x32xbf16>
    tpu.vector_store %arg12[%c0_24, %c0_25], %27 {strides = array<i32>} : memref<16x32xbf16, #tpu.memory_space<vmem>>, vector<16x32xbf16>,
    return
  }
  func.func @transform_0(%arg0: i32) -> (i32, i32) {
    %c0_i32 = arith.constant 0 : i32
    %c0_i32_0 = arith.constant 0 : i32
    return %arg0, %c0_i32 : i32, i32
  }
  func.func @transform_1(%arg0: i32) -> (i32, i32) {
    %c0_i32 = arith.constant 0 : i32
    %c0_i32_0 = arith.constant 0 : i32
    return %arg0, %c0_i32 : i32, i32
  }
  func.func @transform_2(%arg0: i32) -> (i32, i32) {
    %c0_i32 = arith.constant 0 : i32
    %c0_i32_0 = arith.constant 0 : i32
    return %arg0, %c0_i32 : i32, i32
  }
  func.func @transform_3(%arg0: i32) -> (i32, i32) {
    %c0_i32 = arith.constant 0 : i32
    %c0_i32_0 = arith.constant 0 : i32
    %c0_i32_1 = arith.constant 0 : i32
    return %c0_i32, %c0_i32_0 : i32, i32
  }
  func.func @transform_4(%arg0: i32) -> (i32, i32) {
    %c0_i32 = arith.constant 0 : i32
    %c0_i32_0 = arith.constant 0 : i32
    %c0_i32_1 = arith.constant 0 : i32
    return %c0_i32, %c0_i32_0 : i32, i32
  }
  func.func @transform_5(%arg0: i32) -> (i32, i32) {
    %c0_i32 = arith.constant 0 : i32
    %c0_i32_0 = arith.constant 0 : i32
    %c0_i32_1 = arith.constant 0 : i32
    return %c0_i32, %c0_i32_0 : i32, i32
  }
  func.func @transform_6(%arg0: i32) -> (i32, i32) {
    %c0_i32 = arith.constant 0 : i32
    %c0_i32_0 = arith.constant 0 : i32
    %c0_i32_1 = arith.constant 0 : i32
    return %c0_i32, %c0_i32_0 : i32, i32
  }
  func.func @transform_7(%arg0: i32) -> (i32, i32) {
    %c0_i32 = arith.constant 0 : i32
    %c0_i32_0 = arith.constant 0 : i32
    %c0_i32_1 = arith.constant 0 : i32
    return %c0_i32, %c0_i32_0 : i32, i32
  }
  func.func @transform_8(%arg0: i32) -> (i32, i32) {
    %c0_i32 = arith.constant 0 : i32
    %c0_i32_0 = arith.constant 0 : i32
    %c0_i32_1 = arith.constant 0 : i32
    return %c0_i32, %c0_i32_0 : i32, i32
  }
  func.func @transform_9(%arg0: i32) -> (i32, i32) {
    %c0_i32 = arith.constant 0 : i32
    %c0_i32_0 = arith.constant 0 : i32
    return %arg0, %c0_i32 : i32, i32
  }
  func.func @transform_10(%arg0: i32) -> (i32, i32) {
    %c0_i32 = arith.constant 0 : i32
    %c0_i32_0 = arith.constant 0 : i32
    return %arg0, %c0_i32 : i32, i32
  }
  func.func @transform_11(%arg0: i32) -> (i32, i32) {
    %c0_i32 = arith.constant 0 : i32
    %c0_i32_0 = arith.constant 0 : i32
    return %arg0, %c0_i32 : i32, i32
  }
}

module attributes {stable_mosaic.version = 11 : i64} {
  func.func @_mha_kernel(%arg0: i32, %arg1: i32, %arg2: memref<1x8x32xbf16, #tpu.memory_space<vmem>>, %arg3: memref<1x8x32xbf16, #tpu.memory_space<vmem>>, %arg4: memref<1x8x32xbf16, #tpu.memory_space<vmem>>, %arg5: memref<1x1x8xf32, #tpu.memory_space<vmem>>, %arg6: memref<1x8x32xbf16, #tpu.memory_space<vmem>>, %arg7: memref<1x4x8x8xbf16, #tpu.memory_space<vmem>>) attributes {dimension_semantics = [#tpu.dimension_semantics<parallel>, #tpu.dimension_semantics<parallel>], iteration_bounds = array<i64: 2, 1>, scalar_prefetch = 0 : i64, scratch_operands = 0 : i64, tpu.core_type = #tpu.core_type<tc>, window_params = [{transform_indices = @transform_0, window_bounds = array<i64: 1, 8, 32>}, {transform_indices = @transform_1, window_bounds = array<i64: 1, 8, 32>}, {transform_indices = @transform_2, window_bounds = array<i64: 1, 8, 32>}, {transform_indices = @transform_3, window_bounds = array<i64: 1, 1, 8>}, {transform_indices = @transform_4, window_bounds = array<i64: 1, 8, 32>}, {transform_indices = @transform_5, window_bounds = array<i64: 1, 4, 8, 8>}]} {
    %c0 = arith.constant 0 : index
    %c0_0 = arith.constant 0 : index
    %c0_1 = arith.constant 0 : index
    %0 = vector.load %arg2[%c0, %c0_0, %c0_1] : memref<1x8x32xbf16, #tpu.memory_space<vmem>>, vector<1x8x32xbf16>
    %1 = vector.shape_cast %0 : vector<1x8x32xbf16> to vector<8x32xbf16>
    %c0_2 = arith.constant 0 : index
    %c0_3 = arith.constant 0 : index
    %c0_4 = arith.constant 0 : index
    %2 = vector.load %arg3[%c0_2, %c0_3, %c0_4] : memref<1x8x32xbf16, #tpu.memory_space<vmem>>, vector<1x8x32xbf16>
    %3 = vector.shape_cast %2 : vector<1x8x32xbf16> to vector<8x32xbf16>
    %c0_5 = arith.constant 0 : index
    %c0_6 = arith.constant 0 : index
    %c0_7 = arith.constant 0 : index
    %4 = vector.load %arg4[%c0_5, %c0_6, %c0_7] : memref<1x8x32xbf16, #tpu.memory_space<vmem>>, vector<1x8x32xbf16>
    %5 = vector.shape_cast %4 : vector<1x8x32xbf16> to vector<8x32xbf16>
    %c0_8 = arith.constant 0 : index
    %c0_9 = arith.constant 0 : index
    %c0_10 = arith.constant 0 : index
    %6 = vector.load %arg5[%c0_8, %c0_9, %c0_10] : memref<1x1x8xf32, #tpu.memory_space<vmem>>, vector<1x1x8xf32>
    %7 = vector.shape_cast %6 : vector<1x1x8xf32> to vector<1x8xf32>
    %8 = vector.extract_strided_slice %1 {offsets = [0, 0], sizes = [8, 8], strides = [1, 1]} : vector<8x32xbf16> to vector<8x8xbf16>
    %9 = vector.extract_strided_slice %3 {offsets = [0, 0], sizes = [8, 8], strides = [1, 1]} : vector<8x32xbf16> to vector<8x8xbf16>
    %10 = vector.extract_strided_slice %5 {offsets = [0, 0], sizes = [8, 8], strides = [1, 1]} : vector<8x32xbf16> to vector<8x8xbf16>
    %cst = arith.constant dense<0.000000e+00> : vector<8x8xf32>
    %11 = tpu.matmul %8, %9, %cst {dimension_numbers = #tpu.dot_dimension_numbers<[1], [1], [0], [0], [0, 0, 1, 0], [], []>} : vector<8x8xbf16>, vector<8x8xbf16>, vector<8x8xf32> -> vector<8x8xf32>
    %12 = vector.broadcast %7 : vector<1x8xf32> to vector<8x8xf32>
    %13 = arith.addf %11, %12 : vector<8x8xf32>
    %cst_11 = arith.constant dense<0xFF800000> : vector<8xf32>
    %14 = vector.multi_reduction <maximumf>, %13, %cst_11 [1] : vector<8x8xf32> to vector<8xf32>
    %15 = vector.shape_cast %14 : vector<8xf32> to vector<8x1xf32>
    %16 = vector.broadcast %15 : vector<8x1xf32> to vector<8x8xf32>
    %17 = arith.subf %13, %16 : vector<8x8xf32>
    %18 = math.exp %17 : vector<8x8xf32>
    %cst_12 = arith.constant dense<0.000000e+00> : vector<8xf32>
    %19 = vector.multi_reduction <add>, %18, %cst_12 [1] : vector<8x8xf32> to vector<8xf32>
    %20 = vector.shape_cast %19 : vector<8xf32> to vector<8x1xf32>
    %21 = vector.broadcast %20 : vector<8x1xf32> to vector<8x8xf32>
    %22 = arith.divf %18, %21 : vector<8x8xf32>
    %23 = arith.truncf %22 : vector<8x8xf32> to vector<8x8xbf16>
    %c0_13 = arith.constant 0 : index
    %c0_14 = arith.constant 0 : index
    %c0_15 = arith.constant 0 : index
    %c0_16 = arith.constant 0 : index
    %24 = vector.load %arg7[%c0_13, %c0_14, %c0_15, %c0_16] : memref<1x4x8x8xbf16, #tpu.memory_space<vmem>>, vector<1x1x8x8xbf16>
    %25 = vector.shape_cast %24 : vector<1x1x8x8xbf16> to vector<8x8xbf16>
    %26 = vector.shape_cast %23 : vector<8x8xbf16> to vector<1x1x8x8xbf16>
    tpu.vector_store %arg7[%c0_13, %c0_14, %c0_15, %c0_16], %26 {strides = array<i32>} : memref<1x4x8x8xbf16, #tpu.memory_space<vmem>>, vector<1x1x8x8xbf16>,
    %27 = arith.truncf %22 : vector<8x8xf32> to vector<8x8xbf16>
    %cst_17 = arith.constant dense<0.000000e+00> : vector<8x8xf32>
    %28 = tpu.matmul %27, %10, %cst_17 {dimension_numbers = #tpu.dot_dimension_numbers<[1], [0], [0], [1], [0, 0, 1, 1], [], []>} : vector<8x8xbf16>, vector<8x8xbf16>, vector<8x8xf32> -> vector<8x8xf32>
    %29 = arith.truncf %28 : vector<8x8xf32> to vector<8x8xbf16>
    %30 = vector.extract_strided_slice %1 {offsets = [0, 8], sizes = [8, 8], strides = [1, 1]} : vector<8x32xbf16> to vector<8x8xbf16>
    %31 = vector.extract_strided_slice %3 {offsets = [0, 8], sizes = [8, 8], strides = [1, 1]} : vector<8x32xbf16> to vector<8x8xbf16>
    %32 = vector.extract_strided_slice %5 {offsets = [0, 8], sizes = [8, 8], strides = [1, 1]} : vector<8x32xbf16> to vector<8x8xbf16>
    %cst_18 = arith.constant dense<0.000000e+00> : vector<8x8xf32>
    %33 = tpu.matmul %30, %31, %cst_18 {dimension_numbers = #tpu.dot_dimension_numbers<[1], [1], [0], [0], [0, 0, 1, 0], [], []>} : vector<8x8xbf16>, vector<8x8xbf16>, vector<8x8xf32> -> vector<8x8xf32>
    %34 = vector.broadcast %7 : vector<1x8xf32> to vector<8x8xf32>
    %35 = arith.addf %33, %34 : vector<8x8xf32>
    %cst_19 = arith.constant dense<0xFF800000> : vector<8xf32>
    %36 = vector.multi_reduction <maximumf>, %35, %cst_19 [1] : vector<8x8xf32> to vector<8xf32>
    %37 = vector.shape_cast %36 : vector<8xf32> to vector<8x1xf32>
    %38 = vector.broadcast %37 : vector<8x1xf32> to vector<8x8xf32>
    %39 = arith.subf %35, %38 : vector<8x8xf32>
    %40 = math.exp %39 : vector<8x8xf32>
    %cst_20 = arith.constant dense<0.000000e+00> : vector<8xf32>
    %41 = vector.multi_reduction <add>, %40, %cst_20 [1] : vector<8x8xf32> to vector<8xf32>
    %42 = vector.shape_cast %41 : vector<8xf32> to vector<8x1xf32>
    %43 = vector.broadcast %42 : vector<8x1xf32> to vector<8x8xf32>
    %44 = arith.divf %40, %43 : vector<8x8xf32>
    %45 = arith.truncf %44 : vector<8x8xf32> to vector<8x8xbf16>
    %c0_21 = arith.constant 0 : index
    %c1 = arith.constant 1 : index
    %c0_22 = arith.constant 0 : index
    %c0_23 = arith.constant 0 : index
    %46 = vector.load %arg7[%c0_21, %c1, %c0_22, %c0_23] : memref<1x4x8x8xbf16, #tpu.memory_space<vmem>>, vector<1x1x8x8xbf16>
    %47 = vector.shape_cast %46 : vector<1x1x8x8xbf16> to vector<8x8xbf16>
    %48 = vector.shape_cast %45 : vector<8x8xbf16> to vector<1x1x8x8xbf16>
    tpu.vector_store %arg7[%c0_21, %c1, %c0_22, %c0_23], %48 {strides = array<i32>} : memref<1x4x8x8xbf16, #tpu.memory_space<vmem>>, vector<1x1x8x8xbf16>,
    %49 = arith.truncf %44 : vector<8x8xf32> to vector<8x8xbf16>
    %cst_24 = arith.constant dense<0.000000e+00> : vector<8x8xf32>
    %50 = tpu.matmul %49, %32, %cst_24 {dimension_numbers = #tpu.dot_dimension_numbers<[1], [0], [0], [1], [0, 0, 1, 1], [], []>} : vector<8x8xbf16>, vector<8x8xbf16>, vector<8x8xf32> -> vector<8x8xf32>
    %51 = arith.truncf %50 : vector<8x8xf32> to vector<8x8xbf16>
    %52 = vector.extract_strided_slice %1 {offsets = [0, 16], sizes = [8, 8], strides = [1, 1]} : vector<8x32xbf16> to vector<8x8xbf16>
    %53 = vector.extract_strided_slice %3 {offsets = [0, 16], sizes = [8, 8], strides = [1, 1]} : vector<8x32xbf16> to vector<8x8xbf16>
    %54 = vector.extract_strided_slice %5 {offsets = [0, 16], sizes = [8, 8], strides = [1, 1]} : vector<8x32xbf16> to vector<8x8xbf16>
    %cst_25 = arith.constant dense<0.000000e+00> : vector<8x8xf32>
    %55 = tpu.matmul %52, %53, %cst_25 {dimension_numbers = #tpu.dot_dimension_numbers<[1], [1], [0], [0], [0, 0, 1, 0], [], []>} : vector<8x8xbf16>, vector<8x8xbf16>, vector<8x8xf32> -> vector<8x8xf32>
    %56 = vector.broadcast %7 : vector<1x8xf32> to vector<8x8xf32>
    %57 = arith.addf %55, %56 : vector<8x8xf32>
    %cst_26 = arith.constant dense<0xFF800000> : vector<8xf32>
    %58 = vector.multi_reduction <maximumf>, %57, %cst_26 [1] : vector<8x8xf32> to vector<8xf32>
    %59 = vector.shape_cast %58 : vector<8xf32> to vector<8x1xf32>
    %60 = vector.broadcast %59 : vector<8x1xf32> to vector<8x8xf32>
    %61 = arith.subf %57, %60 : vector<8x8xf32>
    %62 = math.exp %61 : vector<8x8xf32>
    %cst_27 = arith.constant dense<0.000000e+00> : vector<8xf32>
    %63 = vector.multi_reduction <add>, %62, %cst_27 [1] : vector<8x8xf32> to vector<8xf32>
    %64 = vector.shape_cast %63 : vector<8xf32> to vector<8x1xf32>
    %65 = vector.broadcast %64 : vector<8x1xf32> to vector<8x8xf32>
    %66 = arith.divf %62, %65 : vector<8x8xf32>
    %67 = arith.truncf %66 : vector<8x8xf32> to vector<8x8xbf16>
    %c0_28 = arith.constant 0 : index
    %c2 = arith.constant 2 : index
    %c0_29 = arith.constant 0 : index
    %c0_30 = arith.constant 0 : index
    %68 = vector.load %arg7[%c0_28, %c2, %c0_29, %c0_30] : memref<1x4x8x8xbf16, #tpu.memory_space<vmem>>, vector<1x1x8x8xbf16>
    %69 = vector.shape_cast %68 : vector<1x1x8x8xbf16> to vector<8x8xbf16>
    %70 = vector.shape_cast %67 : vector<8x8xbf16> to vector<1x1x8x8xbf16>
    tpu.vector_store %arg7[%c0_28, %c2, %c0_29, %c0_30], %70 {strides = array<i32>} : memref<1x4x8x8xbf16, #tpu.memory_space<vmem>>, vector<1x1x8x8xbf16>,
    %71 = arith.truncf %66 : vector<8x8xf32> to vector<8x8xbf16>
    %cst_31 = arith.constant dense<0.000000e+00> : vector<8x8xf32>
    %72 = tpu.matmul %71, %54, %cst_31 {dimension_numbers = #tpu.dot_dimension_numbers<[1], [0], [0], [1], [0, 0, 1, 1], [], []>} : vector<8x8xbf16>, vector<8x8xbf16>, vector<8x8xf32> -> vector<8x8xf32>
    %73 = arith.truncf %72 : vector<8x8xf32> to vector<8x8xbf16>
    %74 = vector.extract_strided_slice %1 {offsets = [0, 24], sizes = [8, 8], strides = [1, 1]} : vector<8x32xbf16> to vector<8x8xbf16>
    %75 = vector.extract_strided_slice %3 {offsets = [0, 24], sizes = [8, 8], strides = [1, 1]} : vector<8x32xbf16> to vector<8x8xbf16>
    %76 = vector.extract_strided_slice %5 {offsets = [0, 24], sizes = [8, 8], strides = [1, 1]} : vector<8x32xbf16> to vector<8x8xbf16>
    %cst_32 = arith.constant dense<0.000000e+00> : vector<8x8xf32>
    %77 = tpu.matmul %74, %75, %cst_32 {dimension_numbers = #tpu.dot_dimension_numbers<[1], [1], [0], [0], [0, 0, 1, 0], [], []>} : vector<8x8xbf16>, vector<8x8xbf16>, vector<8x8xf32> -> vector<8x8xf32>
    %78 = vector.broadcast %7 : vector<1x8xf32> to vector<8x8xf32>
    %79 = arith.addf %77, %78 : vector<8x8xf32>
    %cst_33 = arith.constant dense<0xFF800000> : vector<8xf32>
    %80 = vector.multi_reduction <maximumf>, %79, %cst_33 [1] : vector<8x8xf32> to vector<8xf32>
    %81 = vector.shape_cast %80 : vector<8xf32> to vector<8x1xf32>
    %82 = vector.broadcast %81 : vector<8x1xf32> to vector<8x8xf32>
    %83 = arith.subf %79, %82 : vector<8x8xf32>
    %84 = math.exp %83 : vector<8x8xf32>
    %cst_34 = arith.constant dense<0.000000e+00> : vector<8xf32>
    %85 = vector.multi_reduction <add>, %84, %cst_34 [1] : vector<8x8xf32> to vector<8xf32>
    %86 = vector.shape_cast %85 : vector<8xf32> to vector<8x1xf32>
    %87 = vector.broadcast %86 : vector<8x1xf32> to vector<8x8xf32>
    %88 = arith.divf %84, %87 : vector<8x8xf32>
    %89 = arith.truncf %88 : vector<8x8xf32> to vector<8x8xbf16>
    %c0_35 = arith.constant 0 : index
    %c3 = arith.constant 3 : index
    %c0_36 = arith.constant 0 : index
    %c0_37 = arith.constant 0 : index
    %90 = vector.load %arg7[%c0_35, %c3, %c0_36, %c0_37] : memref<1x4x8x8xbf16, #tpu.memory_space<vmem>>, vector<1x1x8x8xbf16>
    %91 = vector.shape_cast %90 : vector<1x1x8x8xbf16> to vector<8x8xbf16>
    %92 = vector.shape_cast %89 : vector<8x8xbf16> to vector<1x1x8x8xbf16>
    tpu.vector_store %arg7[%c0_35, %c3, %c0_36, %c0_37], %92 {strides = array<i32>} : memref<1x4x8x8xbf16, #tpu.memory_space<vmem>>, vector<1x1x8x8xbf16>,
    %93 = arith.truncf %88 : vector<8x8xf32> to vector<8x8xbf16>
    %cst_38 = arith.constant dense<0.000000e+00> : vector<8x8xf32>
    %94 = tpu.matmul %93, %76, %cst_38 {dimension_numbers = #tpu.dot_dimension_numbers<[1], [0], [0], [1], [0, 0, 1, 1], [], []>} : vector<8x8xbf16>, vector<8x8xbf16>, vector<8x8xf32> -> vector<8x8xf32>
    %95 = arith.truncf %94 : vector<8x8xf32> to vector<8x8xbf16>
    %96 = tpu.concatenate %29, %51, %73, %95 in 1 : vector<8x8xbf16>, vector<8x8xbf16>, vector<8x8xbf16>, vector<8x8xbf16> -> vector<8x32xbf16>
    %c0_39 = arith.constant 0 : index
    %c0_40 = arith.constant 0 : index
    %c0_41 = arith.constant 0 : index
    %97 = vector.load %arg6[%c0_39, %c0_40, %c0_41] : memref<1x8x32xbf16, #tpu.memory_space<vmem>>, vector<1x8x32xbf16>
    %98 = vector.shape_cast %97 : vector<1x8x32xbf16> to vector<8x32xbf16>
    %99 = vector.shape_cast %96 : vector<8x32xbf16> to vector<1x8x32xbf16>
    tpu.vector_store %arg6[%c0_39, %c0_40, %c0_41], %99 {strides = array<i32>} : memref<1x8x32xbf16, #tpu.memory_space<vmem>>, vector<1x8x32xbf16>,
    return
  }
  func.func @transform_0(%arg0: i32, %arg1: i32) -> (i32, i32, i32) {
    %c0_i32 = arith.constant 0 : i32
    %c0_i32_0 = arith.constant 0 : i32
    return %arg0, %arg1, %c0_i32 : i32, i32, i32
  }
  func.func @transform_1(%arg0: i32, %arg1: i32) -> (i32, i32, i32) {
    %c0_i32 = arith.constant 0 : i32
    %c0_i32_0 = arith.constant 0 : i32
    %c0_i32_1 = arith.constant 0 : i32
    return %arg0, %c0_i32, %c0_i32_0 : i32, i32, i32
  }
  func.func @transform_2(%arg0: i32, %arg1: i32) -> (i32, i32, i32) {
    %c0_i32 = arith.constant 0 : i32
    %c0_i32_0 = arith.constant 0 : i32
    %c0_i32_1 = arith.constant 0 : i32
    return %arg0, %c0_i32, %c0_i32_0 : i32, i32, i32
  }
  func.func @transform_3(%arg0: i32, %arg1: i32) -> (i32, i32, i32) {
    %c0_i32 = arith.constant 0 : i32
    %c0_i32_0 = arith.constant 0 : i32
    %c0_i32_1 = arith.constant 0 : i32
    return %arg0, %c0_i32, %c0_i32_0 : i32, i32, i32
  }
  func.func @transform_4(%arg0: i32, %arg1: i32) -> (i32, i32, i32) {
    %c0_i32 = arith.constant 0 : i32
    %c0_i32_0 = arith.constant 0 : i32
    return %arg0, %arg1, %c0_i32 : i32, i32, i32
  }
  func.func @transform_5(%arg0: i32, %arg1: i32) -> (i32, i32, i32, i32) {
    %c0_i32 = arith.constant 0 : i32
    %c0_i32_0 = arith.constant 0 : i32
    %c0_i32_1 = arith.constant 0 : i32
    return %arg0, %c0_i32, %arg1, %c0_i32_0 : i32, i32, i32, i32
  }
}

</mosaic_0001>

<bundles_post_ra>
// kernel: attention_layer_forward.5
= control target key start
LH: loop header
LB: loop body
LE: loop exit
PB: predicated region body
PF: predicated region fallthrough
CT: control target
= control target key end

     0   :  { %v155_v1 = vmov 0.0   ;;  %vm156_vm0 = vmmov 0   ;;  %s195_s0 = inlined_call_operand.vmem [shape: bf16[16,32], index: 0, kind: input, shape index: {}]   ;;  %s196_s1 = inlined_call_operand.vmem [shape: bf16[32,32], index: 1, kind: input, shape index: {}]   ;;  %s197_s2 = inlined_call_operand.vmem [shape: f32[1,32], index: 2, kind: input, shape index: {}]   ;;  %s198_s3 = inlined_call_operand.hbm [shape: f32[16,32], index: 3, kind: output, shape index: {}]  }
   0x1   :  { %v130_v0 = vld [vmem:[%s196_s1 + $0x8] sm:$0xff]   ;;  %117 = vmatprep.subr.bf16.mxu0 %v155_v1  ;;  %v131_v2 = vld [vmem:[%s196_s1] sm:$0xff]   ;;  %121 = vmatprep.mubr.msk.bf16.mxu0 %vm156_vm0, %v155_v1 }
   0x2   :  { %118 = vmatpush3.bf16.msra.mxu0 %v130_v0 }
   0x3   :  { %119 = vmatprep.subr.bf16.mxu0 %v155_v1 }
   0x4   :  { %8 = vsyncpa [#allocation3], 0  ;;  %v132_v3 = vld [vmem:[%s195_s0] sm:$0xff]   ;;  %vm46_vm1 = vcmask 261120   ;;  %s157_s20 = smov [#allocation2]  }
   0x5   :  { %v109_v4 = vld [vmem:[%s197_s2] ss:$0 sm:$0xff]  ;;  %s98_s21 = sshll.u32 %s157_s20, 4  ;;  %s99_s21 = int_to_ptr.vmem [resolvable:$true] %s98_s21 }
   0x6   :  { %120 = vmatpush3.bf16.msra.mxu0 %v131_v2  ;;  %s133_s1 = scalar_lea.vmem %s99_s21, 256  ;;  %p138_p1 = scmp.lt.s32.totalorder %s99_s21, %s99_s21 }
   0x7   :  { %p134_p0 = scmp.ne.s32.totalorder %s99_s21, %s133_s1  ;;  %p139_p2 = scmp.lt.s32.totalorder %s133_s1, %s133_s1 }
   0x9   :  { %122 = vmatmul.mubr.msk.bf16.vlgmr.msra.gmra.mxu0 %vm46_vm1, %v132_v3  ;;  %p140_p3 = por %p139_p2, %p138_p1 }
   0xb   :  { %p141_p4 = pnand %p140_p3, %p134_p0 }
  0xc9   :  { %v84_v5 = vpop.f32.mrf.mxu0 }
  0xca   :  { %v85_v6 = vadd.f32 %v109_v4, %v84_v5 }
  0xcb   :  { %v123_v7 = vpop.f32.mrf.mxu0 }
  0xcc   :  { %91 = vst.msk [vmem:[#allocation2] sm:$0xff] %vm46_vm1, %v85_v6 }
  0xcd   :  { %v87_v8 = vpop.f32.mrf.mxu0 }
  0xce   :  { %v88_v9 = vadd.f32 %v109_v4, %v87_v8 }
  0xcf   :  { %v124_v10 = vpop.f32.mrf.mxu0 }
  0xd0   :  { %92 = vst.msk [vmem:[#allocation2 + $0x8] sm:$0xff] %vm46_vm1, %v88_v9 }
  0xd1   :  { %144 = shalt.err (!%p141_p4)
}
  0xd2   :  { %s158_s0 = smov 128   ;;  %s159_s2 = smov 8  }
  0xd3   :  { %104 = dma.vmem_to_hbm [thread:$0]  %s99_s21, 256, %s198_s3, [#allocation3], %s158_s0, %s158_s0, %s159_s2  }
  0xd4   :  { %153 = dma.done.wait [#allocation3], 256  }
  0xd5   :  { %154 = vsyncadd [#allocation3], 4294967040 }
  0xd6   :  { %108 = vsyncpa [#allocation3], 1 }

// kernel: attention_layer_forward.3
= control target key start
LH: loop header
LB: loop body
LE: loop exit
PB: predicated region body
PF: predicated region fallthrough
CT: control target
= control target key end

     0   :  { %17 = vsyncpa [#allocation3], 0  ;;  %s680_s0 = inlined_call_operand.vmem [shape: f32[16,32], index: 0, kind: input, shape index: {}]   ;;  %s681_s1 = inlined_call_operand.hbm [shape: f32[16,32], index: 1, kind: input, shape index: {}]   ;;  %s682_s2 = inlined_call_operand.hbm [shape: f32[16,32], index: 2, kind: input, shape index: {}]   ;;  %s683_s3 = inlined_call_operand.hbm [shape: bf16[32,32], index: 3, kind: input, shape index: {}]   ;;  %s684_s4 = inlined_call_operand.vmem [shape: f32[1,32], index: 4, kind: input, shape index: {}]   ;;  %s685_s5 = inlined_call_operand.hbm [shape: bf16[32,32], index: 5, kind: input, shape index: {}]   ;;  %s686_s6 = inlined_call_operand.vmem [shape: f32[1,32], index: 6, kind: input, shape index: {}]   ;;  %s687_s7 = inlined_call_operand.hbm [shape: bf16[32,32], index: 7, kind: input, shape index: {}]   ;;  %s688_s8 = inlined_call_operand.vmem [shape: f32[1,32], index: 8, kind: input, shape index: {}]   ;;  %s689_s9 = inlined_call_operand.vmem [shape: bf16[16,32], index: 9, kind: output, shape index: {0}]   ;;  %s690_s10 = inlined_call_operand.vmem [shape: bf16[16,32], index: 10, kind: output, shape index: {1}]   ;;  %s691_s11 = inlined_call_operand.vmem [shape: bf16[16,32], index: 11, kind: output, shape index: {2}]  }
   0x1   :  { %18 = vsyncpa [#allocation5], 0 }
   0x2   :  { %19 = vsyncpa [#allocation8], 0  ;;  %s543_s17 = smov [#allocation4]  }
   0x3   :  { %s39_s18 = sshll.u32 %s543_s17, 4  ;;  %s40_s18 = int_to_ptr.vmem [resolvable:$true] %s39_s18 }
   0x4   :  { %s445_s19 = scalar_lea.vmem %s40_s18, 256  ;;  %p450_p1 = scmp.lt.s32.totalorder %s40_s18, %s40_s18 }
   0x5   :  { %p446_p0 = scmp.ne.s32.totalorder %s40_s18, %s445_s19  ;;  %p451_p2 = scmp.lt.s32.totalorder %s445_s19, %s445_s19 }
   0x7   :  { %p452_p3 = por %p451_p2, %p450_p1 }
   0x9   :  { %p453_p4 = pnand %p452_p3, %p446_p0 }
   0xb   :  { %456 = shalt.err (!%p453_p4)
}
   0xc   :  { %s544_s20 = smov 128   ;;  %s545_s21 = smov 8  }
   0xd   :  { %45 = dma.hbm_to_vmem [thread:$0]  %s682_s2, 256, %s40_s18, [#allocation5], %s544_s20, %s544_s20, %s545_s21  }
   0xe   :  { %s546_s24 = smov [#allocation7]   ;;  %s547_s26 = smov [#allocation2]  }
   0xf   :  { %s65_s25 = sshll.u32 %s546_s24, 4  ;;  %s27_s27 = sshll.u32 %s547_s26, 4  ;;  %s66_s25 = int_to_ptr.vmem [resolvable:$true] %s65_s25  ;;  %s28_s27 = int_to_ptr.vmem [resolvable:$true] %s27_s27 }
  0x10   :  { %s465_s28 = scalar_lea.vmem %s66_s25, 256  ;;  %p470_p6 = scmp.lt.s32.totalorder %s66_s25, %s66_s25 }
  0x11   :  { %p466_p5 = scmp.ne.s32.totalorder %s66_s25, %s465_s28  ;;  %p471_p7 = scmp.lt.s32.totalorder %s465_s28, %s465_s28 }
  0x13   :  { %p472_p8 = por %p471_p7, %p470_p6 }
  0x15   :  { %p473_p9 = pnand %p472_p8, %p466_p5 }
  0x17   :  { %476 = shalt.err (!%p473_p9)
}
  0x18   :  { %s548_s29 = smov 64   ;;  %s549_s30 = smov 4  }
  0x19   :  { %71 = dma.hbm_to_vmem [thread:$0]  %s685_s5, 256, %s66_s25, [#allocation8], %s548_s29, %s548_s29, %s549_s30  }
  0x1a   :  { %s485_s2 = scalar_lea.vmem %s28_s27, 256  ;;  %p490_p11 = scmp.lt.s32.totalorder %s28_s27, %s28_s27 }
  0x1b   :  { %p486_p10 = scmp.ne.s32.totalorder %s28_s27, %s485_s2  ;;  %p491_p12 = scmp.lt.s32.totalorder %s485_s2, %s485_s2 }
  0x1d   :  { %p492_p13 = por %p491_p12, %p490_p11 }
  0x1f   :  { %p493_p0 = pnand %p492_p13, %p486_p10 }
  0x21   :  { %496 = shalt.err (!%p493_p0)
}
  0x22   :  { %33 = dma.hbm_to_vmem [thread:$0]  %s681_s1, 256, %s28_s27, [#allocation3], %s544_s20, %s544_s20, %s545_s21  }
  0x23   :  { %s550_s16 = smov [#allocation6]   ;;  %s551_s18 = smov [#allocation9]  }
  0x24   :  { %s51_s17 = sshll.u32 %s550_s16, 4  ;;  %s79_s19 = sshll.u32 %s551_s18, 4  ;;  %s52_s17 = int_to_ptr.vmem [resolvable:$true] %s51_s17  ;;  %s80_s19 = int_to_ptr.vmem [resolvable:$true] %s79_s19 }
  0x25   :  { %s505_s22 = scalar_lea.vmem %s52_s17, 256  ;;  %p510_p2 = scmp.lt.s32.totalorder %s52_s17, %s52_s17 }
  0x26   :  { %p506_p1 = scmp.ne.s32.totalorder %s52_s17, %s505_s22  ;;  %p511_p3 = scmp.lt.s32.totalorder %s505_s22, %s505_s22 }
  0x28   :  { %p512_p4 = por %p511_p3, %p510_p2 }
  0x2a   :  { %p513_p5 = pnand %p512_p4, %p506_p1 }
  0x2c   :  { %516 = shalt.err (!%p513_p5)
}
  0x2d   :  { %57 = dma.hbm_to_vmem [thread:$0]  %s683_s3, 256, %s52_s17, [#allocation5], %s548_s29, %s548_s29, %s549_s30  }
  0x2e   :  { %s525_s1 = scalar_lea.vmem %s80_s19, 256  ;;  %p530_p7 = scmp.lt.s32.totalorder %s80_s19, %s80_s19 }
  0x2f   :  { %p526_p6 = scmp.ne.s32.totalorder %s80_s19, %s525_s1  ;;  %p531_p8 = scmp.lt.s32.totalorder %s525_s1, %s525_s1 }
  0x31   :  { %p532_p9 = por %p531_p8, %p530_p7 }
  0x33   :  { %p533_p10 = pnand %p532_p9, %p526_p6 }
  0x35   :  { %536 = shalt.err (!%p533_p10)
}
  0x36   :  { %85 = dma.hbm_to_vmem [thread:$0]  %s687_s7, 256, %s80_s19, [#allocation8], %s548_s29, %s548_s29, %s549_s30  }
  0x37   :  { %537 = dma.done.wait [#allocation3], 256  }
  0x38   :  { %538 = vsyncadd [#allocation3], 4294967040 }
  0x39   :  { %539 = dma.done.wait [#allocation5], 512  }
  0x3a   :  { %540 = vsyncadd [#allocation5], 4294966784 }
  0x3b   :  { %541 = dma.done.wait [#allocation8], 512  }
  0x3c   :  { %542 = vsyncadd [#allocation8], 4294966784  ;;  %v552_v0 = vmov 0.0   ;;  %vm553_vm0 = vmmov 0   ;;  %v431_v1 = vld [vmem:[#allocation6 + $0x8] sm:$0xff]   ;;  %v432_v2 = vld [vmem:[#allocation7 + $0x8] sm:$0xff]  }
  0x3d   :  { %396 = vmatprep.subr.bf16.mxu0 %v552_v0  ;;  %404 = vmatprep.subr.bf16.mxu1 %v552_v0  ;;  %v433_v3 = vld [vmem:[#allocation6] sm:$0xff]   ;;  %v105_v5 = vld [vmem:[%s680_s0 + $0x8] sm:$0xff]  ;;  %v434_v6 = vld [vmem:[#allocation7] sm:$0xff]   ;;  %vm130_vm1 = vcmask 261120   ;;  %vm185_vm2 = vcmask 257024  }
  0x3e   :  { %400 = vmatprep.mubr.msk.bf16.mxu0 %vm553_vm0, %v552_v0  ;;  %408 = vmatprep.mubr.msk.bf16.mxu1 %vm553_vm0, %v552_v0  ;;  %v104_v4 = vld [vmem:[%s680_s0] sm:$0xff]  ;;  %v435_v8 = vld [vmem:[#allocation9 + $0x8] sm:$0xff]   ;;  %v268_v13 = vld [vmem:[#allocation4] sm:$0xff] }
  0x3f   :  { %397 = vmatpush3.bf16.msra.mxu0 %v431_v1  ;;  %405 = vmatpush3.bf16.msra.mxu1 %v432_v2  ;;  %v106_v7 = vpack.c.bf16 %v105_v5, %v104_v4  ;;  %v188_v9 = vld [vmem:[#allocation2] sm:$0xff]  ;;  %v189_v10 = vld [vmem:[#allocation2 + $0x8] sm:$0xff]  ;;  %v269_v14 = vld [vmem:[#allocation4 + $0x8] sm:$0xff] }
  0x40   :  { %398 = vmatprep.subr.bf16.mxu0 %v552_v0  ;;  %406 = vmatprep.subr.bf16.mxu1 %v552_v0  ;;  %v190_v11 = vpack.c.bf16 %v189_v10, %v188_v9  ;;  %v436_v12 = vld [vmem:[#allocation9] sm:$0xff]   ;;  %v270_v15 = vpack.c.bf16 %v269_v14, %v268_v13 }
  0x41   :  { %v363_v16 = vld [vmem:[%s684_s4] ss:$0 sm:$0xff] }
  0x42   :  { %v369_v17 = vld [vmem:[%s686_s6] ss:$0 sm:$0xff] }
  0x43   :  { %399 = vmatpush3.bf16.msra.mxu0 %v433_v3  ;;  %407 = vmatpush3.bf16.msra.mxu1 %v434_v6  ;;  %v375_v32 = vld [vmem:[%s688_s8] ss:$0 sm:$0xff] }
  0x44   :  { %412 = vmatprep.subr.bf16.mxu0 %v552_v0 }
  0x46   :  { %401 = vmatmul.mubr.msk.bf16.vlgmr.msra.gmra.mxu0 %vm130_vm1, %v106_v7  ;;  %409 = vmatmul.mubr.msk.bf16.vlgmr.msra.gmra.mxu1 %vm130_vm1, %v190_v11 }
  0x47   :  { %413 = vmatpush3.bf16.msra.mxu0 %v435_v8  ;;  %416 = vmatprep.mubr.msk.bf16.mxu0 %vm553_vm0, %v552_v0 }
  0x48   :  { %414 = vmatprep.subr.bf16.mxu0 %v552_v0 }
  0x4b   :  { %415 = vmatpush3.bf16.msra.mxu0 %v436_v12 }
  0x4e   :  { %417 = vmatmul.mubr.msk.bf16.vlgmr.msra.gmra.mxu0 %vm130_vm1, %v270_v15 }
 0x106   :  { %v168_v18 = vpop.f32.mrf.mxu0  ;;  %v251_v20 = vpop.f32.mrf.mxu1 }
 0x107   :  { %v169_v19 = vadd.f32 %v363_v16, %v168_v18  ;;  %v252_v22 = vadd.f32 %v369_v17, %v251_v20 }
 0x108   :  { %v402_v21 = vpop.f32.mrf.mxu0  ;;  %v410_v24 = vpop.f32.mrf.mxu1 }
 0x109   :  { %v175_v23 = vmul.f32 0.35355338, %v169_v19  ;;  %v383_v25 = vpack.c.bf16 %v252_v22, %v252_v22 }
 0x10a   :  { %v171_v26 = vpop.f32.mrf.mxu0  ;;  %v254_v29 = vpop.f32.mrf.mxu1 }
 0x10b   :  { %v381_v27 = vpack.c.bf16 %v175_v23, %v175_v23  ;;  %v172_v28 = vadd.f32 %v363_v16, %v171_v26  ;;  %266 = vst.msk [vmem:[%s690_s10] sm:$0xf] %vm185_vm2, %v383_v25  ;;  %v255_v31 = vadd.f32 %v369_v17, %v254_v29 }
 0x10c   :  { %v403_v30 = vpop.f32.mrf.mxu0  ;;  %v411_v34 = vpop.f32.mrf.mxu1 }
 0x10d   :  { %186 = vst.msk [vmem:[%s689_s9] sm:$0xf] %vm185_vm2, %v381_v27  ;;  %v176_v33 = vmul.f32 0.35355338, %v172_v28  ;;  %v384_v35 = vpack.c.bf16 %v255_v31, %v255_v31 }
 0x10e   :  { %v331_v36 = vpop.f32.mrf.mxu0 }
 0x10f   :  { %v382_v37 = vpack.c.bf16 %v176_v33, %v176_v33  ;;  %v332_v38 = vadd.f32 %v375_v32, %v331_v36  ;;  %267 = vst.msk [vmem:[%s690_s10 + $0x4] sm:$0xf] %vm185_vm2, %v384_v35 }
 0x110   :  { %v418_v39 = vpop.f32.mrf.mxu0 }
 0x111   :  { %187 = vst.msk [vmem:[%s689_s9 + $0x4] sm:$0xf] %vm185_vm2, %v382_v37  ;;  %v385_v40 = vpack.c.bf16 %v332_v38, %v332_v38 }
 0x112   :  { %v334_v41 = vpop.f32.mrf.mxu0 }
 0x113   :  { %346 = vst.msk [vmem:[%s691_s11] sm:$0xf] %vm185_vm2, %v385_v40  ;;  %v335_v42 = vadd.f32 %v375_v32, %v334_v41 }
 0x114   :  { %v419_v43 = vpop.f32.mrf.mxu0 }
 0x115   :  { %v386_v44 = vpack.c.bf16 %v335_v42, %v335_v42 }
 0x117   :  { %347 = vst.msk [vmem:[%s691_s11 + $0x4] sm:$0xf] %vm185_vm2, %v386_v44 }
 0x118   :  { %360 = vsyncpa [#allocation3], 1 }
 0x119   :  { %361 = vsyncpa [#allocation5], 1 }
 0x11a   :  { %362 = vsyncpa [#allocation8], 1 }

// kernel: attention_layer_forward.4
= control target key start
LH: loop header
LB: loop body
LE: loop exit
PB: predicated region body
PF: predicated region fallthrough
CT: control target
= control target key end

     0   :  { %11 = vsyncpa [#allocation3], 0  ;;  %s1483_s0 = inlined_call_operand.vmem [shape: bf16[2,8,32], index: 0, kind: input, shape index: {}]   ;;  %s1484_s1 = inlined_call_operand.vmem [shape: bf16[2,8,32], index: 1, kind: input, shape index: {}]   ;;  %s1485_s2 = inlined_call_operand.vmem [shape: bf16[2,8,32], index: 2, kind: input, shape index: {}]   ;;  %s1486_s3 = inlined_call_operand.vmem [shape: f32[2,1,8], index: 3, kind: input, shape index: {}]   ;;  %s1487_s4 = inlined_call_operand.vmem [shape: bf16[2,8,32], index: 4, kind: output, shape index: {0}]   ;;  %s1488_s5 = inlined_call_operand.hbm [shape: bf16[2,4,8,8], index: 5, kind: output, shape index: {1}]  }
   0x1   :  { %13 = vsyncpa [#allocation3 + $0x1], 0  ;;  %s1263_s18 = smov 0   ;;  %s1265_s19 = smov 0  }
   0x2   :  { %s1267_s20 = smov 0   ;;  %s1269_s21 = smov 0  }
   0x3   :  { %s1271_s22 = smov 0   ;;  %s1273_s23 = smov 0  }
   0x4 LB: > { %s965_s24 = sadd.s32 4294967295, %s1220_s23   ;;  %s966_s25 = sadd.s32 4294967294, %s1220_s23   ;;  %s1220_s23 = sphi %s1273_s23, %s19_s23   ;;  %s1216_s22 = sphi %s1271_s22, %s1495_s22   ;;  %s1212_s21 = sphi %s1269_s21, %s1494_s21   ;;  %s1208_s20 = sphi %s1267_s20, %s1493_s20   ;;  %s1204_s19 = sphi %s1265_s19, %s1492_s19   ;;  %s1200_s18 = sphi %s1263_s18, %s1491_s18  }
   0x5   : > { %s31_s26 = sadd.s32 1, %s1216_s22  ;;  %s174_s27 = sadd.s32 1, %s1208_s20 }
   0x6   : > { %p33_p0 = scmp.ge.s32.totalorder %s31_s26, 2  ;;  %p184_p1 = scmp.ne.s32.totalorder %s1208_s20, %s1204_s19 }
   0x7   : > { %p185_p2 = scmp.eq.s32.totalorder %s965_s24, 1  ;;  %p190_p3 = scmp.ne.s32.totalorder %s1204_s19, %s1200_s18 }
   0x8   : > { %s1497_s26 = smov (%p33_p0, %s31_s26), 0  ;;  %p191_p5 = scmp.eq.s32.totalorder %s966_s25, 1 }
   0x9   : > { %p1303_p4 = por %p185_p2, %p184_p1  ;;  %s169_s29 = ssub.s32 %s1216_s22, %s1497_s26 }
   0xa   : > { %p969_p6 = scmp.ge.s32.totalorder %s1220_s23, 1  ;;  %p172_p7 = scmp.eq.s32.totalorder %s169_s29, 0 }
   0xb   : > { %p1310_p8 = por %p191_p5, %p190_p3  ;;  %p239_p9 = scmp.lt.s32.totalorder %s1220_s23, 3 }
   0xc   : > { %s1316_s6 = scalar_select %p172_p7, %s1208_s20, %s174_s27  }
   0xd   : > { %p240_p10 = pnand %p969_p6, %p239_p9 }
   0xe   : > { %p287_p11 = scmp.lt.s32.totalorder (!%p240_p10), %s1212_s21, 1  ;;  %s1224_s24 = smov (!%p240_p10), 120  }
   0xf   : > { %243 = sbr.rel (%p240_p10) target bundleno = 1424 (0x590), region = 36  ;;  %s1225_s25 = smov (!%p240_p10), 112  }
  0x10   : > { %s1226_s27 = smov (!%p240_p10), 104   ;;  %s284_s10 = sand.u32 (!%p240_p10), 1, %s1204_s19  }
  0x11   : > { %s1227_s13 = smov (!%p240_p10), 8   ;;  %s995_s15 = sshll.u32 (!%p240_p10), %s1212_s21, 8 }
  0x14   : > { %v1222_v0 = vmov 0.0   ;;  %vm1223_vm0 = vmmov 0   ;;  %s288_s7 = scalar_select %p287_p11, %s1212_s21, 1  ;;  %vm323_vm1 = vcmask 64512   ;;  %vm387_vm2 = vcmask 1043456  }
  0x15   : > { %1012 = vmatprep.subr.bf16.mxu0 %v1222_v0  ;;  %1014 = vmatprep.mubr.msk.bf16.mxu0 %vm1223_vm0, %v1222_v0  ;;  %vm382_vm3 = vcmask 60416   ;;  %s1229_s21 = smov [#allocation2]  }
  0x16   : > { %1018 = vmatprep.subr.bf16.mxu1 %v1222_v0  ;;  %1020 = vmatprep.mubr.msk.bf16.mxu1 %vm1223_vm0, %v1222_v0  ;;  %s1326_s8 = sshll.u32 %s288_s7, 2  ;;  %s304_s17 = scalar_lea.vmem %s1486_s3, %s288_s7 }
  0x17   : > { %s297_s11 = scalar_lea.vmem %s1484_s1, %s1326_s8  ;;  %s293_s14 = scalar_lea.vmem %s1483_s0, %s1326_s8  ;;  %v1344_v4 = vld [vmem:[%s304_s17] ss:$0 sm:$0xff] }
  0x18   : > { %v314_v1 = vld [vmem:[%s297_s11] sm:$0xf]  ;;  %s301_s9 = scalar_lea.vmem %s1485_s2, %s1326_s8  ;;  %s970_s11 = sshll.u32 %s284_s10, 4 }
  0x19   : > { %v328_v2 = vsel %vm323_vm1, %v314_v1, 0  ;;  %v313_v3 = vld [vmem:[%s293_s14] sm:$0xf]  ;;  %v979_v11 = vcombine.low %v314_v1, %v314_v1  ;;  %s1368_s12 = scalar_lea.vmem [#allocation2], %s970_s11  ;;  %s1228_s14 = smov 16  }
  0x1a   : > { %1013 = vmatpush3.bf16.xpose.msra.mxu0 %v328_v2  ;;  %v978_v12 = vcombine.low %v313_v3, %v313_v3  ;;  %v1358_v18 = vld [vmem:[%s301_s9] sm:$0xf]  ;;  %s826_s16 = sshll.u32 %s1368_s12, 4  ;;  %s1148_s7 = sshll.u32 %s1229_s21, 4  ;;  %s1427_s16 = int_to_ptr.vmem [resolvable:$true] %s826_s16  ;;  %s1149_s7 = int_to_ptr.vmem [resolvable:$false] %s1148_s7 }
  0x1b   : > { %1030 = vmatprep.subr.bf16.mxu0 %v1222_v0  ;;  %440 = vrot.lane.b32.xlu1 %v979_v11, %s1224_s24  ;;  %v389_v19 = vsel %vm387_vm2, %v1358_v18, 0  ;;  %v982_v2 = vcombine.low %v1358_v18, %v1358_v18  ;;  %s1144_s29 = scalar_lea.vmem %s1427_s16, 256  ;;  %s1150_s9 = scalar_lea.vmem %s1149_s7, 512 }
  0x1c   : > { %1019 = vmatpush3.bf16.msra.mxu1 %v389_v19  ;;  %p1145_p12 = scmp.ne.s32.totalorder %s1427_s16, %s1144_s29  ;;  %p1151_p1 = scmp.lt.s32.totalorder %s1427_s16, %s1149_s7 }
  0x1d   : > { %1024 = vmatprep.subr.bf16.mxu1 %v1222_v0  ;;  %p1152_p2 = scmp.lt.s32.totalorder %s1150_s9, %s1144_s29 }
  0x1e   : > { %p1146_p13 = pnand %p1145_p12, %p1303_p4 }
  0x1f   : > { %435 = vrot.lane.b32.xlu1 %v978_v12, %s1224_s24  ;;  %p1153_p3 = por %p1152_p2, %p1151_p1 }
  0x20   : > { %p1147_p0 = pneg %p1146_p13 }
  0x21   : > { %1015 = vmatmul.mubr.msk.bf16.vlgmr.msra.gmra.mxu0 %vm323_vm1, %v313_v3 }
  0x22   : > { %1032 = vmatprep.mubr.msk.bf16.mxu0 %vm1223_vm0, %v1222_v0  ;;  %p1154_p5 = pnand %p1153_p3, %p1147_p0 }
  0x23   : > { %554 = vrot.lane.b32.xlu1 %v978_v12, %s1225_s25 }
  0x27   : > { %669 = vrot.lane.b32.xlu1 %v979_v11, %s1226_s27 }
  0x2b   : > { %667 = vrot.lane.b32.xlu1 %v978_v12, %s1226_s27 }
  0x8d   : > { %v441_v22 = vpop.permute.xlu1 %440 }
  0x8e   : > { %v446_v24 = vsel %vm323_vm1, %v441_v22, 0 }
  0x91   : > { %v436_v26 = vpop.permute.xlu1 %435 }
  0x95   : > { %v555_v28 = vpop.permute.xlu1 %554 }
  0x99   : > { %v670_v30 = vpop.permute.xlu1 %669 }
  0x9a   : > { %v675_v31 = vsel %vm323_vm1, %v670_v30, 0 }
  0x9d   : > { %v668_v32 = vpop.permute.xlu1 %667 }
  0xe1   : > { %v364_v5 = vpop.f32.mrf.mxu0 }
  0xe2   : > { %v365_v6 = vadd.f32 %v1344_v4, %v364_v5 }
  0xe3   : > { %v1016_v7 = vpop.f32.mrf.mxu0 }
  0xe4   : > { %v370_v8 = vsel %vm323_vm1, %v365_v6, -inf }
  0xe5   : > { %371 = vmax.xlane.f32.xlu0 %v370_v8  ;;  %v367_v9 = vpop.f32.mrf.mxu0 }
  0xe7   : > { %v1017_v10 = vpop.f32.mrf.mxu0 }
 0x16e   : > { %v372_v13 = vpop.xlane.xlu0 %371 }
 0x16f   : > { %v373_v14 = vsub.f32 %v365_v6, %v372_v13 }
 0x171   : > { %v374_v15 = vmul.f32 1.442695, %v373_v14 }
 0x173   : > { %1128 = vpow2.f32 %v374_v15 }
 0x180   : > { %v1129_v16 = vpop.eup %1128 }
 0x181   : > { %v376_v17 = vsel %vm323_vm1, %v1129_v16, 0.0 }
 0x182   : > { %377 = vadd.xlane.f32.xlu0 %v376_v17 }
 0x198   : > { %556 = vrot.lane.b32.xlu0 %v979_v11, %s1225_s25 }
 0x20b   : > { %v378_v20 = vpop.xlane.xlu0 %377 }
 0x20c   : > { %1130 = vrcp.f32 %v378_v20 }
 0x20f   : > { %v557_v27 = vpop.permute.xlu0 %556 }
 0x210   : > { %v562_v29 = vsel %vm323_vm1, %v557_v27, 0 }
 0x219   : > { %v1131_v21 = vpop.eup %1130 }
 0x21a   : > { %v380_v23 = vmul.f32 %v1131_v21, %v1129_v16 }
 0x21c   : > { %v381_v25 = vpack.c.bf16 %v380_v23, %v380_v23 }
 0x21e   : > { %383 = vst.msk [vmem:[%s1368_s12] sm:$0xf] %vm382_vm3, %v381_v25  ;;  %1021 = vmatmul.mubr.msk.bf16.vlgmr.msra.gmra.mxu1 %vm323_vm1, %v381_v25 }
 0x21f   : > { %1025 = vmatpush3.bf16.xpose.msra.mxu1 %v446_v24  ;;  %1026 = vmatprep.mubr.msk.bf16.mxu1 %vm1223_vm0, %v1222_v0 }
 0x220   : > { %1036 = vmatprep.subr.bf16.mxu1 %v1222_v0 }
 0x226   : > { %1027 = vmatmul.mubr.msk.bf16.vlgmr.msra.gmra.mxu1 %vm323_vm1, %v436_v26 }
 0x227   : > { %1037 = vmatpush3.bf16.xpose.msra.mxu1 %v562_v29  ;;  %1038 = vmatprep.mubr.msk.bf16.mxu1 %vm1223_vm0, %v1222_v0 }
 0x228   : > { %1048 = vmatprep.subr.bf16.mxu1 %v1222_v0 }
 0x22e   : > { %1039 = vmatmul.mubr.msk.bf16.vlgmr.msra.gmra.mxu1 %vm323_vm1, %v555_v28 }
 0x22f   : > { %1049 = vmatpush3.bf16.xpose.msra.mxu1 %v675_v31  ;;  %1050 = vmatprep.mubr.msk.bf16.mxu1 %vm1223_vm0, %v1222_v0 }
 0x236   : > { %1051 = vmatmul.mubr.msk.bf16.vlgmr.msra.gmra.mxu1 %vm323_vm1, %v668_v32 }
 0x2de   : > { %v1386_v33 = vpop.f32.mrf.mxu1 }
 0x2e0   : > { %v1022_v34 = vpop.f32.mrf.mxu1 }
 0x2e2   : > { %v428_v35 = vpop.f32.mrf.mxu1 }
 0x2e4   : > { %v1023_v36 = vpop.f32.mrf.mxu1 }
 0x2e6   : > { %v482_v37 = vpop.f32.mrf.mxu1 }
 0x2e7   : > { %v483_v38 = vadd.f32 %v1344_v4, %v482_v37 }
 0x2e8   : > { %v1028_v39 = vpop.f32.mrf.mxu1 }
 0x2e9   : > { %v488_v40 = vsel %vm323_vm1, %v483_v38, -inf }
 0x2ea   : > { %489 = vmax.xlane.f32.xlu1 %v488_v40  ;;  %v485_v41 = vpop.f32.mrf.mxu1 }
 0x2ec   : > { %v1029_v42 = vpop.f32.mrf.mxu1 }
 0x2ee   : > { %v598_v43 = vpop.f32.mrf.mxu1 }
 0x2ef   : > { %v599_v44 = vadd.f32 %v1344_v4, %v598_v43 }
 0x2f0   : > { %v1040_v45 = vpop.f32.mrf.mxu1 }
 0x2f1   : > { %v604_v46 = vsel %vm323_vm1, %v599_v44, -inf }
 0x2f2   : > { %605 = vmax.xlane.f32.xlu0 %v604_v46  ;;  %v601_v47 = vpop.f32.mrf.mxu1 }
 0x2f4   : > { %v1041_v48 = vpop.f32.mrf.mxu1 }
 0x2f6   : > { %v711_v49 = vpop.f32.mrf.mxu1 }
 0x2f7   : > { %v712_v50 = vadd.f32 %v1344_v4, %v711_v49 }
 0x2f8   : > { %v1052_v51 = vpop.f32.mrf.mxu1 }
 0x2f9   : > { %v717_v52 = vsel %vm323_vm1, %v712_v50, -inf }
 0x2fa   : > { %718 = vmax.xlane.f32.xlu1 %v717_v52  ;;  %v714_v53 = vpop.f32.mrf.mxu1 }
 0x2fc   : > { %v1053_v54 = vpop.f32.mrf.mxu1 }
 0x373   : > { %v490_v55 = vpop.xlane.xlu1 %489 }
 0x374   : > { %v491_v56 = vsub.f32 %v483_v38, %v490_v55 }
 0x376   : > { %v492_v57 = vmul.f32 1.442695, %v491_v56 }
 0x378   : > { %1132 = vpow2.f32 %v492_v57 }
 0x37b   : > { %v606_v58 = vpop.xlane.xlu0 %605 }
 0x37c   : > { %v607_v59 = vsub.f32 %v599_v44, %v606_v58 }
 0x37e   : > { %v608_v60 = vmul.f32 1.442695, %v607_v59 }
 0x380   : > { %1134 = vpow2.f32 %v608_v60 }
 0x383   : > { %v719_v3 = vpop.xlane.xlu1 %718 }
 0x384   : > { %v720_v4 = vsub.f32 %v712_v50, %v719_v3 }
 0x385   : > { %v1133_v61 = vpop.eup %1132 }
 0x386   : > { %v494_v62 = vsel %vm323_vm1, %v1133_v61, 0.0  ;;  %v721_v5 = vmul.f32 1.442695, %v720_v4 }
 0x387   : > { %495 = vadd.xlane.f32.xlu1 %v494_v62 }
 0x388   : > { %1136 = vpow2.f32 %v721_v5 }
 0x38d   : > { %v1135_v63 = vpop.eup %1134 }
 0x38e   : > { %v610_v1 = vsel %vm323_vm1, %v1135_v63, 0.0 }
 0x38f   : > { %611 = vadd.xlane.f32.xlu0 %v610_v1 }
 0x395   : > { %v1137_v6 = vpop.eup %1136 }
 0x396   : > { %v723_v7 = vsel %vm323_vm1, %v1137_v6, 0.0 }
 0x398   : > { %618 = vrot.lane.b32.xlu1 %v982_v2, %s1225_s25  ;;  %s1425_s25 = scalar_lea.hbm %s1488_s5, %s995_s15 }
 0x3a5   : > { %505 = vrot.lane.b32.xlu0 %v982_v2, %s1224_s24 }
 0x3bc   : > { %724 = vadd.xlane.f32.xlu1 %v723_v7 }
 0x3cd   : > { %731 = vrot.lane.b32.xlu1 %v982_v2, %s1226_s27  ;;  %s1431_s27 = scalar_lea.sflag [#allocation3], %s284_s10 }
 0x410   : > { %v496_v8 = vpop.xlane.xlu1 %495 }
 0x411   : > { %1138 = vrcp.f32 %v496_v8 }
 0x414   : > { %v619_v14 = vpop.permute.xlu1 %618 }
 0x415   : > { %v624_v16 = vsel %vm387_vm2, %v619_v14, 0 }
 0x418   : > { %v612_v9 = vpop.xlane.xlu0 %611 }
 0x419   : > { %1140 = vrcp.f32 %v612_v9 }
 0x41c   : > { %v506_v10 = vpop.permute.xlu0 %505 }
 0x41d   : > { %v511_v11 = vsel %vm387_vm2, %v506_v10, 0 }
 0x41e   : > { %v1139_v12 = vpop.eup %1138  ;;  %1031 = vmatpush3.bf16.msra.mxu0 %v511_v11 }
 0x41f   : > { %1042 = vmatprep.subr.bf16.mxu0 %v1222_v0  ;;  %v498_v13 = vmul.f32 %v1139_v12, %v1133_v61 }
 0x421   : > { %v499_v15 = vpack.c.bf16 %v498_v13, %v498_v13 }
 0x423   : > { %981 = vst.msk [vmem:[%s1368_s12 + $0x4] sm:$0xf] %vm382_vm3, %v499_v15  ;;  %1033 = vmatmul.mubr.msk.bf16.vlgmr.msra.gmra.mxu0 %vm323_vm1, %v499_v15 }
 0x424   : > { %1043 = vmatpush3.bf16.msra.mxu0 %v624_v16  ;;  %1044 = vmatprep.mubr.msk.bf16.mxu0 %vm1223_vm0, %v1222_v0 }
 0x425   : > { %1054 = vmatprep.subr.bf16.mxu0 %v1222_v0 }
 0x426   : > { %v1141_v17 = vpop.eup %1140 }
 0x427   : > { %v614_v18 = vmul.f32 %v1141_v17, %v1135_v63 }
 0x429   : > { %v615_v19 = vpack.c.bf16 %v614_v18, %v614_v18 }
 0x42b   : > { %985 = vst.msk [vmem:[%s1368_s12 + $0x8] sm:$0xf] %vm382_vm3, %v615_v19  ;;  %1045 = vmatmul.mubr.msk.bf16.vlgmr.msra.gmra.mxu0 %vm323_vm1, %v615_v19 }
 0x42c   : > { %1056 = vmatprep.mubr.msk.bf16.mxu0 %vm1223_vm0, %v1222_v0 }
 0x445   : > { %v725_v20 = vpop.xlane.xlu1 %724 }
 0x446   : > { %1142 = vrcp.f32 %v725_v20 }
 0x449   : > { %v732_v21 = vpop.permute.xlu1 %731 }
 0x44a   : > { %v737_v22 = vsel %vm387_vm2, %v732_v21, 0 }
 0x44b   : > { %1055 = vmatpush3.bf16.msra.mxu0 %v737_v22 }
 0x453   : > { %v1143_v23 = vpop.eup %1142 }
 0x454   : > { %v727_v24 = vmul.f32 %v1143_v23, %v1137_v6 }
 0x456   : > { %v728_v25 = vpack.c.bf16 %v727_v24, %v727_v24 }
 0x458   : > { %988 = vst.msk [vmem:[%s1368_s12 + $0xc] sm:$0xf] %vm382_vm3, %v728_v25  ;;  %1057 = vmatmul.mubr.msk.bf16.vlgmr.msra.gmra.mxu0 %vm323_vm1, %v728_v25 }
 0x4e3   : > { %v547_v26 = vpop.f32.mrf.mxu0 }
 0x4e4   : > { %v553_v27 = vpack.c.bf16 %v547_v26, %v547_v26 }
 0x4e5   : > { %v1034_v28 = vpop.f32.mrf.mxu0 }
 0x4e6   : > { %781 = vrot.lane.b32.xlu0 %v553_v27, %s1227_s13 }
 0x4e7   : > { %v550_v0 = vpop.f32.mrf.mxu0 }
 0x4e9   : > { %v1035_v29 = vpop.f32.mrf.mxu0 }
 0x4eb   : > { %v660_v30 = vpop.f32.mrf.mxu0 }
 0x4ec   : > { %v666_v31 = vpack.c.bf16 %v660_v30, %v660_v30 }
 0x4ed   : > { %v1046_v32 = vpop.f32.mrf.mxu0 }
 0x4ee   : > { %784 = vrot.lane.b32.xlu1 %v666_v31, %s1228_s14 }
 0x4ef   : > { %v663_v34 = vpop.f32.mrf.mxu0 }
 0x4f1   : > { %v1047_v35 = vpop.f32.mrf.mxu0 }
 0x4f2   : > { %1157 = shalt.err (!%p1154_p5)
}
 0x4f3   : > { %s1158_s10 = scalar_lea.hbm %s1425_s25, 256  ;;  %s1162_s13 = scalar_lea.hbm %s1488_s5, 512 }
 0x4f4   : > { %p1159_p6 = scmp.ne.s32.totalorder %s1425_s25, %s1158_s10  ;;  %p1163_p10 = scmp.lt.s32.totalorder %s1425_s25, %s1488_s5 }
 0x4f5   : > { %p1164_p11 = scmp.lt.s32.totalorder %s1162_s13, %s1158_s10 }
 0x4f6   : > { %p1160_p7 = pnand %p1159_p6, %p1303_p4 }
 0x4f7   : > { %p1165_p12 = por %p1164_p11, %p1163_p10 }
 0x4f8   : > { %p1161_p9 = pneg %p1160_p7 }
 0x4fa   : > { %p1166_p13 = pnand %p1165_p12, %p1161_p9 }
 0x4fc   : > { %1169 = shalt.err (!%p1166_p13)
}
 0x4fd   : > { %s1230_s17 = smov 64   ;;  %s1231_s24 = smov 4   ;;  %v431_v42 = vpack.c.bf16 %v1386_v33, %v1386_v33  ;;  %vm792_vm4 = vcmask 130048   ;;  %vm795_vm5 = vcmask 195584   ;;  %vm799_vm6 = vcmask 257024  }
 0x4fe   : > { %1060 = dma.vmem_to_hbm [thread:$0]  (%p1303_p4), %s1427_s16, 256, %s1425_s25, %s1431_s27, %s1230_s17, %s1230_s17, %s1231_s24  }
 0x4ff   : > { %s1232_s29 = smov 24   ;;  %s311_s28 = scalar_lea.vmem %s1487_s4, %s1326_s8 }
 0x518   : > { %v773_v36 = vpop.f32.mrf.mxu0 }
 0x519   : > { %v779_v37 = vpack.c.bf16 %v773_v36, %v773_v36 }
 0x51a   : > { %v1058_v38 = vpop.f32.mrf.mxu0 }
 0x51b   : > { %787 = vrot.lane.b32.xlu0 %v779_v37, %s1232_s29 }
 0x51c   : > { %v776_v39 = vpop.f32.mrf.mxu0 }
 0x51e   : > { %v1059_v40 = vpop.f32.mrf.mxu0 }
 0x558   : > { %v782_v41 = vpop.permute.xlu0 %781 }
 0x559   : > { %v791_v44 = vsel %vm323_vm1, %v431_v42, %v782_v41 }
 0x560   : > { %v785_v43 = vpop.permute.xlu1 %784 }
 0x561   : > { %v794_v45 = vsel %vm792_vm4, %v791_v44, %v785_v43 }
 0x58d   : > { %v788_v46 = vpop.permute.xlu0 %787 }
 0x58e   : > { %v797_v47 = vsel %vm795_vm5, %v794_v45, %v788_v46 }
 0x58f   : > { %800 = vst.msk [vmem:[%s311_s28] sm:$0xf] %vm799_vm6, %v797_v47 }
 0x590 PF: > { %p1066_p4 = scmp.ge.s32.totalorder %s1220_s23, 2  ;;  %s851_s16 = sand.u32 1, %s1200_s18  }
 0x591   : > { %s852_s25 = scalar_lea.sflag [#allocation3], %s851_s16 }
 0x592   : > { %p1063_p0 = pnand %p1066_p4, %p1310_p8 }
 0x594   : > { %p1064_p1 = pneg %p1063_p0 }
 0x596   : > { %1195 = dma.done.wait (%p1064_p1), %s852_s25, 256  }
 0x597   : > { %1197 = vsyncadd (%p1064_p1), %s852_s25, 4294967040  ;;  %s19_s23 = sadd.s32 1, %s1220_s23   ;;  %s1491_s18 = smov %s1204_s19 }
 0x598   : > { %p16_p2 = scmp.ge.s32.totalorder %s19_s23, 4   ;;  %s1492_s19 = smov %s1208_s20 }
 0x599   : > { %s1493_s20 = smov %s1316_s6  ;;  %s1494_s21 = smov %s1216_s22 }
 0x59a   : > { %s1495_s22 = smov %s1497_s26  ;;  %18 = sbr.rel (!%p16_p2) target bundleno = 4 (0x4), region = 95 }
 0x59f   :  { %857 = vsyncpa [#allocation3], 1 }
 0x5a0   :  { %859 = vsyncpa [#allocation3 + $0x1], 1 }

</bundles_post_ra>
